<compile_context>
chip_gen: v5e
topology: v5e:2x2
jax: 0.10.0
libtpu: 0.0.40
codegen_flags: <defaults>
</compile_context>

<pallas_src>
import jax
import jax.numpy as jnp
from jax.experimental import pallas as pl
from jax.experimental.pallas import tpu as pltpu


def ann_uni_kernel(x_ref, w1_ref, b1_ref, w2_ref, b2_ref, o_ref):
    x = x_ref[...]                                   # [TB, IN]      f32
    w1 = w1_ref[...]                                 # [IN, Hp]      resident
    b1 = b1_ref[...]                                 # [1,  Hp]      resident
    w2 = w2_ref[...]                                 # [Hp, OUT]     resident
    b2 = b2_ref[...]                                 # [1,  OUT]     resident

    # fc1 + ReLU  (MXU matmul, f32 accumulate); Hp = 128 -> lane-dense h1.
    h1 = jnp.dot(x, w1, preferred_element_type=jnp.float32) + b1
    h1 = jnp.maximum(h1, 0.0)

    # fc2 + ReLU
    h2 = jnp.dot(h1, w2, preferred_element_type=jnp.float32) + b2
    h2 = jnp.maximum(h2, 0.0)

    # log_softmax over the class dim (dim=1 for 2-D input in PyTorch)
    m = jnp.max(h2, axis=-1, keepdims=True)
    s = h2 - m
    lse = jnp.log(jnp.sum(jnp.exp(s), axis=-1, keepdims=True))
    o_ref[...] = s - lse


def ann_uni_forward(x, w1, b1, w2, b2):
    B, IN = x.shape
    H = w1.shape[1]
    OUT = w2.shape[1]

    # Zero-pad the hidden dim to a multiple of 128 (exact under ReLU: padded
    # hidden units stay 0 and add nothing to fc2).
    Hp = ((H + 127) // 128) * 128
    pad_h = Hp - H
    w1p = jnp.pad(w1, ((0, 0), (0, pad_h)))                  # [IN, Hp]
    b1p = jnp.pad(b1.reshape(1, H), ((0, 0), (0, pad_h)))    # [1,  Hp]
    w2p = jnp.pad(w2, ((0, pad_h), (0, 0)))                  # [Hp, OUT]
    b2p = b2.reshape(1, OUT)                                 # [1,  OUT]

    # At most 2 grid steps: big contiguous x/out DMAs, minimal per-step
    # pipeline overhead, and v7x megacore can still split the two steps.
    num_steps = 2 if B >= 16 else 1
    tb = pl.cdiv(B, num_steps)
    if tb != B and tb % 8 != 0:
        tb = ((tb + 7) // 8) * 8          # keep non-full tiles 8-aligned
    grid = (pl.cdiv(B, tb),)

    f32 = jnp.dtype(jnp.float32).itemsize
    cost = pl.CostEstimate(
        flops=2 * B * (IN * Hp + Hp * OUT),
        transcendentals=B * (OUT + 1),           # exp per class + log per row
        bytes_accessed=(B * IN + IN * Hp + Hp + Hp * OUT + OUT + B * OUT) * f32,
    )

    return pl.pallas_call(
        ann_uni_kernel,
        out_shape=jax.ShapeDtypeStruct((B, OUT), jnp.float32),
        grid_spec=pltpu.PrefetchScalarGridSpec(
            num_scalar_prefetch=0,
            grid=grid,
            in_specs=[
                pl.BlockSpec((tb, IN), lambda i: (i, 0)),     # x: batch-tiled
                pl.BlockSpec((IN, Hp), lambda i: (0, 0)),     # w1: resident
                pl.BlockSpec((1, Hp), lambda i: (0, 0)),      # b1: resident
                pl.BlockSpec((Hp, OUT), lambda i: (0, 0)),    # w2: resident
                pl.BlockSpec((1, OUT), lambda i: (0, 0)),     # b2: resident
            ],
            out_specs=pl.BlockSpec((tb, OUT), lambda i: (i, 0)),
        ),
        compiler_params=pltpu.CompilerParams(
            dimension_semantics=("parallel",),    # megacore split on v7x
        ),
        cost_estimate=cost,
    )(x, w1p, b1p, w2p, b2p)


def _reference(x, w1, b1, w2, b2):
    h1 = jnp.maximum(x @ w1 + b1, 0.0)
    h2 = jnp.maximum(h1 @ w2 + b2, 0.0)
    return jax.nn.log_softmax(h2, axis=-1)


if __name__ == "__main__":
    INFACTORS = 10
    HIDDEN = 100
    OUT = 10
    BATCH = 128          # small batch; still exercises the 2-step grid

    key = jax.random.PRNGKey(0)
    kx, k1, kb1, k2, kb2 = jax.random.split(key, 5)

    x = jax.random.normal(kx, (BATCH, INFACTORS), dtype=jnp.float32)

    # Deterministic param init (uniform, mimicking nn.Linear's scale).
    lim1 = 1.0 / jnp.sqrt(INFACTORS)
    w1 = jax.random.uniform(k1, (INFACTORS, HIDDEN), jnp.float32, -lim1, lim1)
    b1 = jax.random.uniform(kb1, (1, HIDDEN), jnp.float32, -lim1, lim1)

    lim2 = 1.0 / jnp.sqrt(HIDDEN)
    w2 = jax.random.uniform(k2, (HIDDEN, OUT), jnp.float32, -lim2, lim2)
    b2 = jax.random.uniform(kb2, (1, OUT), jnp.float32, -lim2, lim2)

    out = ann_uni_forward(x, w1, b1, w2, b2)
    out = jax.block_until_ready(out)

    ref = _reference(x, w1, b1, w2, b2)
    assert out.shape == (BATCH, OUT)
    assert jnp.allclose(out, ref, atol=2e-5, rtol=2e-5), "mismatch vs reference"

    print("KERNEL_OK")
</pallas_src>

<mosaic_0001>
module attributes {stable_mosaic.version = 11 : i64} {
  func.func @ann_uni_kernel(%arg0: i32, %arg1: memref<64x10xf32, #tpu.memory_space<vmem>>, %arg2: memref<10x128xf32, #tpu.memory_space<vmem>>, %arg3: memref<1x128xf32, #tpu.memory_space<vmem>>, %arg4: memref<128x10xf32, #tpu.memory_space<vmem>>, %arg5: memref<1x10xf32, #tpu.memory_space<vmem>>, %arg6: memref<64x10xf32, #tpu.memory_space<vmem>>) attributes {dimension_semantics = [#tpu.dimension_semantics<parallel>], iteration_bounds = array<i64: 2>, scalar_prefetch = 0 : i64, scratch_operands = 0 : i64, tpu.core_type = #tpu.core_type<tc>, window_params = [{transform_indices = @transform_0, window_bounds = array<i64: 64, 10>}, {pipeline_mode = #tpu.pipeline_mode<synchronous>, transform_indices = @transform_1, window_bounds = array<i64: 10, 128>}, {pipeline_mode = #tpu.pipeline_mode<synchronous>, transform_indices = @transform_2, window_bounds = array<i64: 1, 128>}, {pipeline_mode = #tpu.pipeline_mode<synchronous>, transform_indices = @transform_3, window_bounds = array<i64: 128, 10>}, {pipeline_mode = #tpu.pipeline_mode<synchronous>, transform_indices = @transform_4, window_bounds = array<i64: 1, 10>}, {transform_indices = @transform_5, window_bounds = array<i64: 64, 10>}]} {
    %c0 = arith.constant 0 : index
    %c0_0 = arith.constant 0 : index
    %0 = vector.load %arg1[%c0, %c0_0] : memref<64x10xf32, #tpu.memory_space<vmem>>, vector<64x10xf32>
    %c0_1 = arith.constant 0 : index
    %c0_2 = arith.constant 0 : index
    %1 = vector.load %arg2[%c0_1, %c0_2] : memref<10x128xf32, #tpu.memory_space<vmem>>, vector<10x128xf32>
    %c0_3 = arith.constant 0 : index
    %c0_4 = arith.constant 0 : index
    %2 = vector.load %arg3[%c0_3, %c0_4] : memref<1x128xf32, #tpu.memory_space<vmem>>, vector<1x128xf32>
    %c0_5 = arith.constant 0 : index
    %c0_6 = arith.constant 0 : index
    %3 = vector.load %arg4[%c0_5, %c0_6] : memref<128x10xf32, #tpu.memory_space<vmem>>, vector<128x10xf32>
    %c0_7 = arith.constant 0 : index
    %c0_8 = arith.constant 0 : index
    %4 = vector.load %arg5[%c0_7, %c0_8] : memref<1x10xf32, #tpu.memory_space<vmem>>, vector<1x10xf32>
    %cst = arith.constant dense<0.000000e+00> : vector<64x128xf32>
    %5 = tpu.matmul %0, %1, %cst {dimension_numbers = #tpu.dot_dimension_numbers<[1], [0], [0], [1], [0, 0, 1, 1], [], []>} : vector<64x10xf32>, vector<10x128xf32>, vector<64x128xf32> -> vector<64x128xf32>
    %6 = vector.broadcast %2 : vector<1x128xf32> to vector<64x128xf32>
    %7 = arith.addf %5, %6 : vector<64x128xf32>
    %cst_9 = arith.constant 0.000000e+00 : f32
    %8 = vector.broadcast %cst_9 : f32 to vector<64x128xf32>
    %9 = arith.maximumf %7, %8 : vector<64x128xf32>
    %cst_10 = arith.constant dense<0.000000e+00> : vector<64x10xf32>
    %10 = tpu.matmul %9, %3, %cst_10 {dimension_numbers = #tpu.dot_dimension_numbers<[1], [0], [0], [1], [0, 0, 1, 1], [], []>} : vector<64x128xf32>, vector<128x10xf32>, vector<64x10xf32> -> vector<64x10xf32>
    %11 = vector.broadcast %4 : vector<1x10xf32> to vector<64x10xf32>
    %12 = arith.addf %10, %11 : vector<64x10xf32>
    %cst_11 = arith.constant 0.000000e+00 : f32
    %13 = vector.broadcast %cst_11 : f32 to vector<64x10xf32>
    %14 = arith.maximumf %12, %13 : vector<64x10xf32>
    %cst_12 = arith.constant dense<0xFF800000> : vector<64xf32>
    %15 = vector.multi_reduction <maximumf>, %14, %cst_12 [1] : vector<64x10xf32> to vector<64xf32>
    %16 = vector.shape_cast %15 : vector<64xf32> to vector<64x1xf32>
    %17 = vector.broadcast %16 : vector<64x1xf32> to vector<64x10xf32>
    %18 = arith.subf %14, %17 : vector<64x10xf32>
    %19 = math.exp %18 : vector<64x10xf32>
    %cst_13 = arith.constant dense<0.000000e+00> : vector<64xf32>
    %20 = vector.multi_reduction <add>, %19, %cst_13 [1] : vector<64x10xf32> to vector<64xf32>
    %21 = vector.shape_cast %20 : vector<64xf32> to vector<64x1xf32>
    %22 = math.log %21 : vector<64x1xf32>
    %23 = vector.broadcast %22 : vector<64x1xf32> to vector<64x10xf32>
    %24 = arith.subf %18, %23 : vector<64x10xf32>
    %c0_14 = arith.constant 0 : index
    %c0_15 = arith.constant 0 : index
    %25 = vector.load %arg6[%c0_14, %c0_15] : memref<64x10xf32, #tpu.memory_space<vmem>>, vector<64x10xf32>
    tpu.vector_store %arg6[%c0_14, %c0_15], %24 {strides = array<i32>} : memref<64x10xf32, #tpu.memory_space<vmem>>, vector<64x10xf32>,
    return
  }
  func.func @transform_0(%arg0: i32) -> (i32, i32) {
    %c0_i32 = arith.constant 0 : i32
    %c0_i32_0 = arith.constant 0 : i32
    return %arg0, %c0_i32 : i32, i32
  }
  func.func @transform_1(%arg0: i32) -> (i32, i32) {
    %c0_i32 = arith.constant 0 : i32
    %c0_i32_0 = arith.constant 0 : i32
    %c0_i32_1 = arith.constant 0 : i32
    return %c0_i32, %c0_i32_0 : i32, i32
  }
  func.func @transform_2(%arg0: i32) -> (i32, i32) {
    %c0_i32 = arith.constant 0 : i32
    %c0_i32_0 = arith.constant 0 : i32
    %c0_i32_1 = arith.constant 0 : i32
    return %c0_i32, %c0_i32_0 : i32, i32
  }
  func.func @transform_3(%arg0: i32) -> (i32, i32) {
    %c0_i32 = arith.constant 0 : i32
    %c0_i32_0 = arith.constant 0 : i32
    %c0_i32_1 = arith.constant 0 : i32
    return %c0_i32, %c0_i32_0 : i32, i32
  }
  func.func @transform_4(%arg0: i32) -> (i32, i32) {
    %c0_i32 = arith.constant 0 : i32
    %c0_i32_0 = arith.constant 0 : i32
    %c0_i32_1 = arith.constant 0 : i32
    return %c0_i32, %c0_i32_0 : i32, i32
  }
  func.func @transform_5(%arg0: i32) -> (i32, i32) {
    %c0_i32 = arith.constant 0 : i32
    %c0_i32_0 = arith.constant 0 : i32
    return %arg0, %c0_i32 : i32, i32
  }
}

</mosaic_0001>

<bundles_post_ra>
// kernel: tpu_custom_call.1
= control target key start
LH: loop header
LB: loop body
LE: loop exit
PB: predicated region body
PF: predicated region fallthrough
CT: control target
= control target key end

     0   :  { %s681_s18 = smov 0   ;;  %s833_s0 = inlined_call_operand.vmem [shape: f32[128,10], index: 0, kind: input, shape index: {}]   ;;  %s834_s1 = inlined_call_operand.vmem [shape: f32[10,128], index: 1, kind: input, shape index: {}]   ;;  %s835_s2 = inlined_call_operand.vmem [shape: f32[1,128], index: 2, kind: input, shape index: {}]   ;;  %s836_s3 = inlined_call_operand.vmem [shape: f32[128,10], index: 3, kind: input, shape index: {}]   ;;  %s837_s4 = inlined_call_operand.vmem [shape: f32[1,10], index: 4, kind: input, shape index: {}]   ;;  %s838_s5 = inlined_call_operand.vmem [shape: f32[128,10], index: 5, kind: output, shape index: {}]  }
   0x1 LB: > { %s549_s19 = sadd.s32 4294967295, %s649_s18   ;;  %p553_p0 = scmp.ge.s32.totalorder %s649_s18, 1  ;;  %s649_s18 = sphi %s681_s18, %s15_s18  }
   0x2   : > { %p188_p1 = scmp.lt.s32.totalorder %s649_s18, 3 }
   0x4   : > { %p189_p2 = pnand %p553_p0, %p188_p1 }
   0x5   : > { %s554_s24 = sshll.u32 (!%p189_p2), %s549_s19, 3 }
   0x6   : > { %192 = sbr.rel (%p189_p2) target bundleno = 594 (0x252), region = 40  ;;  %p217_p3 = scmp.lt.s32.totalorder (!%p189_p2), %s554_s24, 15 }
   0xb   : > { %v237_v0 = vld [vmem:[%s834_s1 + $0x8] sm:$0x3]  ;;  %vm284_vm0 = vcmask 1041408   ;;  %v236_v1 = vld [vmem:[%s834_s1] sm:$0xff]  ;;  %s840_s24 = smov (!%p217_p3, %s554_s24), 15  ;;  %vm259_vm1 = vcmask 80896  }
   0xc   : > { %558 = vmatpush.msk.msra.mxu0 %vm284_vm0, %v237_v0  ;;  %s555_s25 = sshll.u32 %s840_s24, 3  ;;  %v254_v6 = vld [vmem:[%s836_s3 + $0x78] sm:$0xff]  ;;  %v253_v7 = vld [vmem:[%s836_s3 + $0x70] sm:$0xff]  ;;  %v252_v8 = vld [vmem:[%s836_s3 + $0x68] sm:$0xff] }
   0xd   : > { %s703_s28 = scalar_lea.vmem %s833_s0, %s555_s25  ;;  %340 = vmatpush.msra.mxu1 %v254_v6  ;;  %569 = vmatpush.msra.mxu2 %v254_v6  ;;  %v251_v9 = vld [vmem:[%s836_s3 + $0x60] sm:$0xff]  ;;  %v250_v11 = vld [vmem:[%s836_s3 + $0x58] sm:$0xff]  ;;  %v249_v12 = vld [vmem:[%s836_s3 + $0x50] sm:$0xff]  ;;  %s808_s21 = scalar_lea.vmem %s838_s5, %s555_s25 }
   0xe   : > { %303 = vmatpush.msra.mxu0 %v236_v1  ;;  %v228_v2 = vld [vmem:[%s703_s28] sm:$0xff]  ;;  %v229_v3 = vld [vmem:[%s703_s28 + $0x8] sm:$0xff]  ;;  %v230_v4 = vld [vmem:[%s703_s28 + $0x10] sm:$0xff]  ;;  %570 = vmatpush.msra.mxu3 %v254_v6 }
   0xf   : > { %559 = vmatmul.msk.f32.vlgmr.msra.gmra.mxu0 %vm259_vm1, %v228_v2  ;;  %v231_v5 = vld [vmem:[%s703_s28 + $0x18] sm:$0xff]  ;;  %341 = vmatpush.msra.mxu1 %v253_v7  ;;  %v232_v10 = vld [vmem:[%s703_s28 + $0x20] sm:$0xff]  ;;  %v248_v13 = vld [vmem:[%s836_s3 + $0x48] sm:$0xff] }
  0x10   : > { %571 = vmatpush.msra.mxu2 %v253_v7  ;;  %572 = vmatpush.msra.mxu3 %v253_v7  ;;  %v247_v14 = vld [vmem:[%s836_s3 + $0x40] sm:$0xff]  ;;  %v233_v15 = vld [vmem:[%s703_s28 + $0x28] sm:$0xff]  ;;  %v246_v16 = vld [vmem:[%s836_s3 + $0x38] sm:$0xff] }
  0x11   : > { %342 = vmatpush.msra.mxu1 %v252_v8  ;;  %v245_v17 = vld [vmem:[%s836_s3 + $0x30] sm:$0xff]  ;;  %v244_v18 = vld [vmem:[%s836_s3 + $0x28] sm:$0xff]  ;;  %v243_v19 = vld [vmem:[%s836_s3 + $0x20] sm:$0xff] }
  0x12   : > { %573 = vmatpush.msra.mxu2 %v252_v8  ;;  %574 = vmatpush.msra.mxu3 %v252_v8  ;;  %v234_v20 = vld [vmem:[%s703_s28 + $0x30] sm:$0xff]  ;;  %v242_v21 = vld [vmem:[%s836_s3 + $0x18] sm:$0xff]  ;;  %v240_v24 = vld [vmem:[%s836_s3 + $0x8] sm:$0xff] }
  0x13   : > { %343 = vmatpush.msra.mxu1 %v251_v9  ;;  %v235_v22 = vld [vmem:[%s703_s28 + $0x38] sm:$0xff]  ;;  %v241_v23 = vld [vmem:[%s836_s3 + $0x10] sm:$0xff]  ;;  %v239_v25 = vld [vmem:[%s836_s3] sm:$0xff] }
  0x14   : > { %575 = vmatpush.msra.mxu2 %v251_v9  ;;  %576 = vmatpush.msra.mxu3 %v251_v9  ;;  %v609_v26 = vld [vmem:[%s835_s2] ss:$0 sm:$0xff] }
  0x15   : > { %344 = vmatpush.msra.mxu1 %v250_v11  ;;  %v610_v51 = vld [vmem:[%s837_s4] ss:$0 sm:$0xff] }
  0x16   : > { %577 = vmatpush.msra.mxu2 %v250_v11  ;;  %578 = vmatpush.msra.mxu3 %v250_v11 }
  0x17   : > { %560 = vmatmul.msk.f32.gmra.mxu0 %vm259_vm1, %v229_v3  ;;  %345 = vmatpush.msra.mxu1 %v249_v12 }
  0x18   : > { %579 = vmatpush.msra.mxu2 %v249_v12  ;;  %580 = vmatpush.msra.mxu3 %v249_v12 }
  0x19   : > { %346 = vmatpush.msra.mxu1 %v248_v13 }
  0x1a   : > { %581 = vmatpush.msra.mxu2 %v248_v13  ;;  %582 = vmatpush.msra.mxu3 %v248_v13 }
  0x1b   : > { %347 = vmatpush.msra.mxu1 %v247_v14 }
  0x1c   : > { %583 = vmatpush.msra.mxu2 %v247_v14  ;;  %584 = vmatpush.msra.mxu3 %v247_v14 }
  0x1d   : > { %348 = vmatpush.msra.mxu1 %v246_v16 }
  0x1e   : > { %585 = vmatpush.msra.mxu2 %v246_v16  ;;  %586 = vmatpush.msra.mxu3 %v246_v16 }
  0x1f   : > { %561 = vmatmul.msk.f32.gmra.mxu0 %vm259_vm1, %v230_v4  ;;  %349 = vmatpush.msra.mxu1 %v245_v17 }
  0x20   : > { %587 = vmatpush.msra.mxu2 %v245_v17  ;;  %588 = vmatpush.msra.mxu3 %v245_v17 }
  0x21   : > { %350 = vmatpush.msra.mxu1 %v244_v18 }
  0x22   : > { %589 = vmatpush.msra.mxu2 %v244_v18  ;;  %590 = vmatpush.msra.mxu3 %v244_v18 }
  0x23   : > { %351 = vmatpush.msra.mxu1 %v243_v19 }
  0x24   : > { %591 = vmatpush.msra.mxu2 %v243_v19  ;;  %592 = vmatpush.msra.mxu3 %v243_v19 }
  0x25   : > { %352 = vmatpush.msra.mxu1 %v242_v21 }
  0x26   : > { %593 = vmatpush.msra.mxu2 %v242_v21  ;;  %594 = vmatpush.msra.mxu3 %v242_v21 }
  0x27   : > { %562 = vmatmul.msk.f32.gmra.mxu0 %vm259_vm1, %v231_v5  ;;  %353 = vmatpush.msra.mxu1 %v241_v23 }
  0x28   : > { %595 = vmatpush.msra.mxu2 %v241_v23  ;;  %596 = vmatpush.msra.mxu3 %v241_v23 }
  0x29   : > { %354 = vmatpush.msra.mxu1 %v240_v24 }
  0x2a   : > { %597 = vmatpush.msra.mxu2 %v240_v24  ;;  %598 = vmatpush.msra.mxu3 %v240_v24 }
  0x2b   : > { %355 = vmatpush.msra.mxu1 %v239_v25 }
  0x2c   : > { %599 = vmatpush.msra.mxu2 %v239_v25  ;;  %600 = vmatpush.msra.mxu3 %v239_v25 }
  0x2f   : > { %563 = vmatmul.msk.f32.gmra.mxu0 %vm259_vm1, %v232_v10 }
  0x37   : > { %564 = vmatmul.msk.f32.gmra.mxu0 %vm259_vm1, %v233_v15 }
  0x3f   : > { %565 = vmatmul.msk.f32.gmra.mxu0 %vm259_vm1, %v234_v20 }
  0x47   : > { %566 = vmatmul.msk.f32.gmra.mxu0 %vm259_vm1, %v235_v22 }
  0x8c   : > { %v305_v27 = vpop.f32.mrf.mxu0 }
  0x8d   : > { %v306_v28 = vadd.f32 %v609_v26, %v305_v27 }
  0x8f   : > { %v329_v29 = vmax.f32 %v306_v28, 0.0 }
  0x91   : > { %356 = vmatmul.f32.vlgmr.msra.gmra.mxu1 %v329_v29 }
  0x94   : > { %v308_v30 = vpop.f32.mrf.mxu0 }
  0x95   : > { %v309_v31 = vadd.f32 %v609_v26, %v308_v30 }
  0x97   : > { %v330_v32 = vmax.f32 %v309_v31, 0.0 }
  0x99   : > { %359 = vmatmul.f32.gmra.mxu1 %v330_v32 }
  0x9c   : > { %v311_v33 = vpop.f32.mrf.mxu0 }
  0x9d   : > { %v312_v34 = vadd.f32 %v609_v26, %v311_v33 }
  0x9f   : > { %v331_v35 = vmax.f32 %v312_v34, 0.0 }
  0xa1   : > { %362 = vmatmul.f32.gmra.mxu1 %v331_v35 }
  0xa4   : > { %v314_v36 = vpop.f32.mrf.mxu0 }
  0xa5   : > { %v315_v37 = vadd.f32 %v609_v26, %v314_v36 }
  0xa7   : > { %v332_v38 = vmax.f32 %v315_v37, 0.0 }
  0xa9   : > { %365 = vmatmul.f32.vlgmr.msra.gmra.mxu2 %v332_v38 }
  0xac   : > { %v317_v39 = vpop.f32.mrf.mxu0 }
  0xad   : > { %v318_v40 = vadd.f32 %v609_v26, %v317_v39 }
  0xaf   : > { %v333_v41 = vmax.f32 %v318_v40, 0.0 }
  0xb1   : > { %368 = vmatmul.f32.vlgmr.msra.gmra.mxu3 %v333_v41 }
  0xb4   : > { %v320_v42 = vpop.f32.mrf.mxu0 }
  0xb5   : > { %v321_v43 = vadd.f32 %v609_v26, %v320_v42 }
  0xb7   : > { %v334_v44 = vmax.f32 %v321_v43, 0.0 }
  0xb9   : > { %371 = vmatmul.f32.gmra.mxu3 %v334_v44 }
  0xbc   : > { %v323_v45 = vpop.f32.mrf.mxu0 }
  0xbd   : > { %v324_v46 = vadd.f32 %v609_v26, %v323_v45 }
  0xbf   : > { %v335_v47 = vmax.f32 %v324_v46, 0.0 }
  0xc1   : > { %374 = vmatmul.f32.gmra.mxu3 %v335_v47 }
  0xc4   : > { %v326_v48 = vpop.f32.mrf.mxu0 }
  0xc5   : > { %v327_v49 = vadd.f32 %v609_v26, %v326_v48 }
  0xc7   : > { %v336_v50 = vmax.f32 %v327_v49, 0.0 }
  0xc9   : > { %377 = vmatmul.f32.gmra.mxu3 %v336_v50 }
 0x10e   : > { %v357_v52 = vpop.f32.mrf.mxu1 }
 0x10f   : > { %v358_v53 = vadd.f32 %v610_v51, %v357_v52 }
 0x111   : > { %v381_v54 = vmax.f32 %v358_v53, 0.0 }
 0x113   : > { %v389_v55 = vsel %vm259_vm1, %v381_v54, -inf }
 0x114   : > { %390 = vmax.xlane.f32.xlu0 %v389_v55 }
 0x116   : > { %v360_v56 = vpop.f32.mrf.mxu1 }
 0x117   : > { %v361_v57 = vadd.f32 %v610_v51, %v360_v56 }
 0x119   : > { %v382_v58 = vmax.f32 %v361_v57, 0.0 }
 0x11b   : > { %v392_v59 = vsel %vm259_vm1, %v382_v58, -inf }
 0x11c   : > { %393 = vmax.xlane.f32.xlu0 %v392_v59 }
 0x11e   : > { %v363_v60 = vpop.f32.mrf.mxu1 }
 0x11f   : > { %v364_v61 = vadd.f32 %v610_v51, %v363_v60 }
 0x121   : > { %v383_v62 = vmax.f32 %v364_v61, 0.0 }
 0x123   : > { %v395_v63 = vsel %vm259_vm1, %v383_v62, -inf }
 0x124   : > { %396 = vmax.xlane.f32.xlu1 %v395_v63 }
 0x12c   : > { %v366_v0 = vpop.f32.mrf.mxu2 }
 0x12d   : > { %v367_v1 = vadd.f32 %v610_v51, %v366_v0 }
 0x12f   : > { %v384_v2 = vmax.f32 %v367_v1, 0.0 }
 0x131   : > { %v398_v3 = vsel %vm259_vm1, %v384_v2, -inf }
 0x132   : > { %399 = vmax.xlane.f32.xlu1 %v398_v3 }
 0x134   : > { %v369_v4 = vpop.f32.mrf.mxu3 }
 0x135   : > { %v370_v5 = vadd.f32 %v610_v51, %v369_v4 }
 0x137   : > { %v385_v6 = vmax.f32 %v370_v5, 0.0 }
 0x139   : > { %v401_v7 = vsel %vm259_vm1, %v385_v6, -inf }
 0x13a   : > { %402 = vmax.xlane.f32.xlu2 %v401_v7 }
 0x13c   : > { %v372_v8 = vpop.f32.mrf.mxu3 }
 0x13d   : > { %v373_v9 = vadd.f32 %v610_v51, %v372_v8 }
 0x13f   : > { %v386_v10 = vmax.f32 %v373_v9, 0.0 }
 0x141   : > { %v404_v11 = vsel %vm259_vm1, %v386_v10, -inf }
 0x142   : > { %405 = vmax.xlane.f32.xlu2 %v404_v11 }
 0x144   : > { %v375_v12 = vpop.f32.mrf.mxu3 }
 0x145   : > { %v376_v13 = vadd.f32 %v610_v51, %v375_v12 }
 0x147   : > { %v387_v14 = vmax.f32 %v376_v13, 0.0 }
 0x149   : > { %v407_v15 = vsel %vm259_vm1, %v387_v14, -inf }
 0x14a   : > { %408 = vmax.xlane.f32.xlu0 %v407_v15 }
 0x14c   : > { %v378_v16 = vpop.f32.mrf.mxu3 }
 0x14d   : > { %v379_v17 = vadd.f32 %v610_v51, %v378_v16 }
 0x14f   : > { %v388_v18 = vmax.f32 %v379_v17, 0.0 }
 0x151   : > { %v410_v19 = vsel %vm259_vm1, %v388_v18, -inf }
 0x152   : > { %411 = vmax.xlane.f32.xlu1 %v410_v19 }
 0x187   : > { %v391_v20 = vpop.xlane.xlu0 %390 }
 0x188   : > { %v783_v21 = vsub.f32 %v381_v54, %v391_v20 }
 0x18a   : > { %v421_v22 = vmul.f32 1.442695, %v783_v21 }
 0x18c   : > { %611 = vpow2.f32 %v421_v22 }
 0x18f   : > { %v394_v23 = vpop.xlane.xlu0 %393 }
 0x190   : > { %v786_v24 = vsub.f32 %v382_v58, %v394_v23 }
 0x192   : > { %v612_v25 = vpop.eup %611  ;;  %v423_v26 = vmul.f32 1.442695, %v786_v24 }
 0x193   : > { %v437_v27 = vsel %vm259_vm1, %v612_v25, 0.0 }
 0x194   : > { %613 = vpow2.f32 %v423_v26  ;;  %438 = vadd.xlane.f32.xlu2 %v437_v27 }
 0x197   : > { %v397_v28 = vpop.xlane.xlu1 %396 }
 0x198   : > { %v790_v29 = vsub.f32 %v383_v62, %v397_v28 }
 0x19a   : > { %v614_v30 = vpop.eup %613  ;;  %v425_v31 = vmul.f32 1.442695, %v790_v29 }
 0x19b   : > { %v440_v32 = vsel %vm259_vm1, %v614_v30, 0.0 }
 0x19c   : > { %615 = vpow2.f32 %v425_v31  ;;  %441 = vadd.xlane.f32.xlu0 %v440_v32 }
 0x1a2   : > { %v616_v33 = vpop.eup %615 }
 0x1a3   : > { %v443_v34 = vsel %vm259_vm1, %v616_v33, 0.0 }
 0x1a4   : > { %444 = vadd.xlane.f32.xlu1 %v443_v34 }
 0x1a5   : > { %v400_v35 = vpop.xlane.xlu1 %399 }
 0x1a6   : > { %v416_v36 = vsub.f32 %v384_v2, %v400_v35 }
 0x1a8   : > { %v427_v37 = vmul.f32 1.442695, %v416_v36 }
 0x1aa   : > { %617 = vpow2.f32 %v427_v37 }
 0x1ad   : > { %v403_v38 = vpop.xlane.xlu2 %402 }
 0x1ae   : > { %v795_v39 = vsub.f32 %v385_v6, %v403_v38 }
 0x1b0   : > { %v618_v40 = vpop.eup %617  ;;  %v429_v41 = vmul.f32 1.442695, %v795_v39 }
 0x1b1   : > { %v446_v42 = vsel %vm259_vm1, %v618_v40, 0.0 }
 0x1b2   : > { %619 = vpow2.f32 %v429_v41  ;;  %447 = vadd.xlane.f32.xlu2 %v446_v42 }
 0x1b5   : > { %v406_v43 = vpop.xlane.xlu2 %405 }
 0x1b6   : > { %v418_v44 = vsub.f32 %v386_v10, %v406_v43 }
 0x1b8   : > { %v620_v45 = vpop.eup %619  ;;  %v431_v46 = vmul.f32 1.442695, %v418_v44 }
 0x1b9   : > { %v449_v47 = vsel %vm259_vm1, %v620_v45, 0.0 }
 0x1ba   : > { %621 = vpow2.f32 %v431_v46  ;;  %450 = vadd.xlane.f32.xlu0 %v449_v47 }
 0x1bd   : > { %v409_v48 = vpop.xlane.xlu0 %408 }
 0x1be   : > { %v419_v49 = vsub.f32 %v387_v14, %v409_v48 }
 0x1c0   : > { %v622_v50 = vpop.eup %621  ;;  %v433_v51 = vmul.f32 1.442695, %v419_v49 }
 0x1c1   : > { %v452_v52 = vsel %vm259_vm1, %v622_v50, 0.0 }
 0x1c2   : > { %623 = vpow2.f32 %v433_v51  ;;  %453 = vadd.xlane.f32.xlu1 %v452_v52 }
 0x1c5   : > { %v412_v53 = vpop.xlane.xlu1 %411 }
 0x1c6   : > { %v420_v54 = vsub.f32 %v388_v18, %v412_v53 }
 0x1c8   : > { %v624_v55 = vpop.eup %623  ;;  %v435_v56 = vmul.f32 1.442695, %v420_v54 }
 0x1c9   : > { %v455_v57 = vsel %vm259_vm1, %v624_v55, 0.0 }
 0x1ca   : > { %625 = vpow2.f32 %v435_v56  ;;  %456 = vadd.xlane.f32.xlu2 %v455_v57 }
 0x1d0   : > { %v626_v58 = vpop.eup %625 }
 0x1d1   : > { %v458_v59 = vsel %vm259_vm1, %v626_v58, 0.0 }
 0x1d2   : > { %459 = vadd.xlane.f32.xlu0 %v458_v59 }
 0x207   : > { %v439_v60 = vpop.xlane.xlu2 %438 }
 0x208   : > { %627 = vlog2.f32 %v439_v60 }
 0x20e   : > { %v628_v61 = vpop.eup %627 }
 0x20f   : > { %v462_v62 = vmul.f32 0.6931472, %v628_v61  ;;  %v442_v63 = vpop.xlane.xlu0 %441 }
 0x210   : > { %629 = vlog2.f32 %v442_v63 }
 0x211   : > { %v477_v0 = vsub.f32 %v783_v21, %v462_v62 }
 0x213   : > { %485 = vst.msk [vmem:[%s808_s21] sm:$0xff] %vm259_vm1, %v477_v0 }
 0x216   : > { %v630_v1 = vpop.eup %629 }
 0x217   : > { %v464_v2 = vmul.f32 0.6931472, %v630_v1  ;;  %v445_v3 = vpop.xlane.xlu1 %444 }
 0x218   : > { %631 = vlog2.f32 %v445_v3 }
 0x219   : > { %v478_v4 = vsub.f32 %v786_v24, %v464_v2 }
 0x21b   : > { %486 = vst.msk [vmem:[%s808_s21 + $0x8] sm:$0xff] %vm259_vm1, %v478_v4 }
 0x21e   : > { %v632_v5 = vpop.eup %631 }
 0x21f   : > { %v466_v6 = vmul.f32 0.6931472, %v632_v5 }
 0x221   : > { %v479_v7 = vsub.f32 %v790_v29, %v466_v6 }
 0x223   : > { %487 = vst.msk [vmem:[%s808_s21 + $0x10] sm:$0xff] %vm259_vm1, %v479_v7 }
 0x225   : > { %v448_v8 = vpop.xlane.xlu2 %447 }
 0x226   : > { %633 = vlog2.f32 %v448_v8 }
 0x22c   : > { %v634_v9 = vpop.eup %633 }
 0x22d   : > { %v468_v10 = vmul.f32 0.6931472, %v634_v9  ;;  %v451_v11 = vpop.xlane.xlu0 %450 }
 0x22e   : > { %635 = vlog2.f32 %v451_v11 }
 0x22f   : > { %v480_v12 = vsub.f32 %v416_v36, %v468_v10 }
 0x231   : > { %488 = vst.msk [vmem:[%s808_s21 + $0x18] sm:$0xff] %vm259_vm1, %v480_v12 }
 0x234   : > { %v636_v13 = vpop.eup %635 }
 0x235   : > { %v470_v14 = vmul.f32 0.6931472, %v636_v13  ;;  %v454_v15 = vpop.xlane.xlu1 %453 }
 0x236   : > { %637 = vlog2.f32 %v454_v15 }
 0x237   : > { %v481_v16 = vsub.f32 %v795_v39, %v470_v14 }
 0x239   : > { %489 = vst.msk [vmem:[%s808_s21 + $0x20] sm:$0xff] %vm259_vm1, %v481_v16 }
 0x23c   : > { %v638_v17 = vpop.eup %637 }
 0x23d   : > { %v472_v18 = vmul.f32 0.6931472, %v638_v17  ;;  %v457_v19 = vpop.xlane.xlu2 %456 }
 0x23e   : > { %639 = vlog2.f32 %v457_v19 }
 0x23f   : > { %v482_v20 = vsub.f32 %v418_v44, %v472_v18 }
 0x241   : > { %490 = vst.msk [vmem:[%s808_s21 + $0x28] sm:$0xff] %vm259_vm1, %v482_v20 }
 0x244   : > { %v640_v21 = vpop.eup %639 }
 0x245   : > { %v474_v22 = vmul.f32 0.6931472, %v640_v21  ;;  %v460_v23 = vpop.xlane.xlu0 %459 }
 0x246   : > { %641 = vlog2.f32 %v460_v23 }
 0x247   : > { %v483_v24 = vsub.f32 %v419_v49, %v474_v22 }
 0x249   : > { %491 = vst.msk [vmem:[%s808_s21 + $0x30] sm:$0xff] %vm259_vm1, %v483_v24 }
 0x24c   : > { %v642_v25 = vpop.eup %641 }
 0x24d   : > { %v476_v26 = vmul.f32 0.6931472, %v642_v25 }
 0x24f   : > { %v484_v27 = vsub.f32 %v420_v54, %v476_v26 }
 0x251   : > { %492 = vst.msk [vmem:[%s808_s21 + $0x38] sm:$0xff] %vm259_vm1, %v484_v27 }
 0x252 PF: > { %s15_s18 = sadd.s32 1, %s649_s18  }
 0x253   : > { %p12_p4 = scmp.ge.s32.totalorder %s15_s18, 4  }
 0x255   :  { %14 = sbr.rel (!%p12_p4) target bundleno = 1 (0x1), region = 70 }

</bundles_post_ra>
